<compile_context>
chip_gen: v7x
topology: tpu7x:2x2x1
jax: 0.10.0
libtpu: 0.0.40
codegen_flags: <defaults>
</compile_context>

<pallas_src>
import functools

import jax
import jax.numpy as jnp
from jax import lax
from jax.experimental import pallas as pl
from jax.experimental.pallas import tpu as pltpu

EPS = 1e-5  # torch.nn.GroupNorm default eps


def _downscale_kernel(xp_ref, wb_ref, bias_ref, o_ref):
    # xp_ref  : (1, 4C, TP) compute_dtype  patch columns (P lane-dense)
    # wb_ref  : (1, OC, 4C) compute_dtype  per-sample weight (GN+FiLM folded in)
    # bias_ref: (1, OC, 1)  f32            per-sample bias   (GN+FiLM folded in)
    # o_ref   : (1, OC, TP) f32            lane-dense output tile
    y = jnp.dot(wb_ref[0], xp_ref[0], preferred_element_type=jnp.float32)
    o_ref[0] = (y + bias_ref[0]).astype(o_ref.dtype)


def _round_up(v, m):
    return -(-v // m) * m


def _vmem_budget_bytes():
    # Generation-aware budget for the pipeline's double buffers.
    # v5e/v6e (128 MiB physical) -> 32 MiB of buffers; v7x (64 MiB) -> 16 MiB.
    try:
        cap = int(pltpu.get_tpu_info().vmem_capacity_bytes)
    except Exception:
        cap = 64 << 20  # conservative (v7x-sized) fallback
    return max(12 << 20, min(cap // 4, 32 << 20))


def _buffer_footprint(tp, k4, oc, x_itemsize):
    # Approximate padded VMEM bytes for the pipeline buffers at tile size tp.
    k4p = _round_up(k4, 16)      # sublane pad (16 covers packed bf16)
    ocp = _round_up(oc, 16)
    tpp = _round_up(tp, 128)     # lane pad
    xp = 2 * k4p * tpp * x_itemsize        # double-buffered patch input
    out = 2 * ocp * tpp * 4                # double-buffered f32 output
    wb = 2 * ocp * k4p * x_itemsize        # per-sample weight
    bias = 2 * ocp * 128 * 4               # per-sample bias (padded)
    return xp + out + wb + bias


def _pick_tile(P, k4, oc, x_itemsize, batch, budget):
    # Largest TP that (a) divides P, (b) is a multiple of 128 (or equals P),
    # (c) keeps the double-buffer footprint under budget, (d) leaves >= 2
    # total grid steps when possible (megacore utilisation on v7x).
    cands = [t for t in (2048, 1024, 512, 256, 128)
             if t <= P and P % t == 0
             and _buffer_footprint(t, k4, oc, x_itemsize) <= budget]
    if not cands:
        return P                      # tiny P (or no 128-divisor): full extent
    for t in cands:                   # cands sorted descending
        if batch * (P // t) >= 2:
            return t
    return cands[-1]


@functools.partial(jax.jit, static_argnames=("compute_dtype",))
def downscale(x_nchw, embedding, we_conv, be, wd_conv, bd,
              compute_dtype=jnp.bfloat16):
    """Forward pass of DownScale.

    x_nchw   : (B, C, H, W)        float32
    embedding: (B, E, 1, 1)        float32
    we_conv  : (2C, E, 1, 1)       Conv2d(n_embedding, 2C, 1) weight
    be       : (2C,)               its bias
    wd_conv  : (OC, C, 2, 2)       Conv2d(C, OC, kernel_size=2, stride=2) weight
    bd       : (OC,)               its bias
    returns  : (B, OC, H//2, W//2) float32
    """
    B, C, H, W = x_nchw.shape
    OC = wd_conv.shape[0]
    E = we_conv.shape[1]
    assert H % 2 == 0 and W % 2 == 0
    Ho, Wo = H // 2, W // 2
    P = Ho * Wo
    K4 = 4 * C
    x_itemsize = jnp.dtype(compute_dtype).itemsize

    budget = _vmem_budget_bytes()
    TP = _pick_tile(P, K4, OC, x_itemsize, B, budget)
    footprint = _buffer_footprint(TP, K4, OC, x_itemsize)
    vmem_limit = int(max(16 << 20, min(footprint + (8 << 20), 48 << 20)))

    xf32 = x_nchw.astype(jnp.float32)

    # ---- hoisted embedding 1x1 conv: O(B*E*2C), independent of x ----
    ss = embedding.reshape(B, E) @ we_conv.reshape(2 * C, E).T + be      # (B,2C)
    scale = ss[:, :C] + 1.0
    shift = ss[:, C:]

    # ---- GroupNorm(1, affine=False) stats: single pass (sum & sum-of-sq) ----
    # fp32 throughout; clamp guards E[x^2]-E[x]^2 cancellation when |mean|>>std.
    n = C * H * W
    s1 = jnp.sum(xf32, axis=(1, 2, 3))
    s2 = jnp.sum(xf32 * xf32, axis=(1, 2, 3))
    mean = s1 / n
    var = jnp.maximum(s2 / n - mean * mean, 0.0)
    rstd = lax.rsqrt(var + EPS)

    # fused GN + FiLM affine per (sample, channel):  xf = x * a + b_aff
    a = scale * rstd[:, None]                                            # (B,C)
    b_aff = shift - mean[:, None] * a                                    # (B,C)

    # conv weight as a GEMM matrix, k = (dy*2 + dx)*C + c
    w_mat = jnp.transpose(wd_conv, (0, 2, 3, 1)).reshape(OC, K4)         # f32
    a4 = jnp.tile(a, (1, 4))                                             # (B,K4)
    b4 = jnp.tile(b_aff, (1, 4))                                         # (B,K4)

    # ---- fold the affine into the GEMM operands (per sample) ----
    #   y = W @ (a*x + b) + bd  =  (a*W) @ x + (W @ b + bd)
    # fp32 scale, then cast to the MXU streaming dtype.
    wb = (w_mat[None, :, :] * a4[:, None, :]).astype(compute_dtype)      # (B,OC,K4)
    bias = (b4 @ w_mat.T + bd[None, :]).reshape(B, OC, 1)                # f32

    # ---- patch layout (B, 4C, P): P is the lane axis end to end ----
    # reshape is free; transpose + bf16 cast is one fused HBM pass under jit.
    xp = (jnp.transpose(xf32.reshape(B, C, Ho, 2, Wo, 2),
                        (0, 3, 5, 1, 2, 4))        # (B, dy, dx, C, Ho, Wo)
          .reshape(B, K4, P)
          .astype(compute_dtype))

    cost = pl.CostEstimate(
        flops=2 * B * P * K4 * OC,
        transcendentals=0,
        bytes_accessed=(B * P * K4 * x_itemsize + B * P * OC * 4
                        + B * OC * K4 * x_itemsize + B * OC * 4))

    out = pl.pallas_call(
        _downscale_kernel,
        out_shape=jax.ShapeDtypeStruct((B, OC, P), jnp.float32),
        grid_spec=pltpu.PrefetchScalarGridSpec(
            num_scalar_prefetch=0,
            grid=(B, P // TP),
            in_specs=[
                pl.BlockSpec((1, K4, TP), lambda bi, ti: (bi, 0, ti)),
                pl.BlockSpec((1, OC, K4), lambda bi, ti: (bi, 0, 0)),
                pl.BlockSpec((1, OC, 1), lambda bi, ti: (bi, 0, 0)),
            ],
            out_specs=pl.BlockSpec((1, OC, TP), lambda bi, ti: (bi, 0, ti)),
        ),
        compiler_params=pltpu.CompilerParams(
            dimension_semantics=("parallel", "parallel"),
            vmem_limit_bytes=vmem_limit),
        cost_estimate=cost,
    )(xp, wb, bias)

    # (B, OC, P) -> (B, OC, Ho, Wo): contiguous reshape, no output transpose.
    return out.reshape(B, OC, Ho, Wo)


def reference(x_nchw, embedding, we_conv, be, wd_conv, bd):
    """Pure-JAX reference matching the PyTorch forward exactly."""
    B, C, H, W = x_nchw.shape
    E = we_conv.shape[1]
    ss = jnp.einsum('be,oe->bo', embedding.reshape(B, E),
                    we_conv.reshape(-1, E)) + be                         # (B,2C)
    scale, shift = ss[:, :C], ss[:, C:]
    mean = jnp.mean(x_nchw, axis=(1, 2, 3), keepdims=True)
    var = jnp.mean((x_nchw - mean) ** 2, axis=(1, 2, 3), keepdims=True)
    xn = (x_nchw - mean) * lax.rsqrt(var + EPS)
    xf = xn * (scale + 1.0)[:, :, None, None] + shift[:, :, None, None]
    y = lax.conv_general_dilated(xf, wd_conv, window_strides=(2, 2),
                                 padding='VALID',
                                 dimension_numbers=('NCHW', 'OIHW', 'NCHW'))
    return y + bd[None, :, None, None]


if __name__ == "__main__":
    B, C_in, C_out, E, H, W = 2, 4, 8, 32, 16, 16

    key = jax.random.PRNGKey(0)
    ks = jax.random.split(key, 6)
    x = jax.random.normal(ks[0], (B, C_in, H, W), jnp.float32)
    embedding = jax.random.normal(ks[1], (B, E, 1, 1), jnp.float32)
    we_conv = 0.1 * jax.random.normal(ks[2], (2 * C_in, E, 1, 1), jnp.float32)
    be = 0.1 * jax.random.normal(ks[3], (2 * C_in,), jnp.float32)
    wd_conv = 0.1 * jax.random.normal(ks[4], (C_out, C_in, 2, 2), jnp.float32)
    bd = 0.1 * jax.random.normal(ks[5], (C_out,), jnp.float32)

    ref = reference(x, embedding, we_conv, be, wd_conv, bd)

    # fp32 streaming path: strict tolerance.
    out_f32 = jax.block_until_ready(
        downscale(x, embedding, we_conv, be, wd_conv, bd,
                  compute_dtype=jnp.float32))
    assert out_f32.shape == (B, C_out, H // 2, W // 2)
    assert jnp.allclose(out_f32, ref, atol=1e-4, rtol=1e-4), "fp32 mismatch"

    # bf16 streaming path (default, MXU-valid on v5e/v6e/v7x): loose tolerance.
    out_bf16 = jax.block_until_ready(
        downscale(x, embedding, we_conv, be, wd_conv, bd,
                  compute_dtype=jnp.bfloat16))
    assert jnp.allclose(out_bf16, ref, atol=3e-2, rtol=3e-2), "bf16 mismatch"

    print("KERNEL_OK")
</pallas_src>

<mosaic_0001>
module attributes {stable_mosaic.version = 11 : i64} {
  func.func @_downscale_kernel(%arg0: i32, %arg1: i32, %arg2: memref<1x16x64xf32, #tpu.memory_space<vmem>>, %arg3: memref<1x8x16xf32, #tpu.memory_space<vmem>>, %arg4: memref<1x8x1xf32, #tpu.memory_space<vmem>>, %arg5: memref<1x8x64xf32, #tpu.memory_space<vmem>>) attributes {dimension_semantics = [#tpu.dimension_semantics<parallel>, #tpu.dimension_semantics<parallel>], iteration_bounds = array<i64: 2, 1>, scalar_prefetch = 0 : i64, scratch_operands = 0 : i64, tpu.core_type = #tpu.core_type<tc>, window_params = [{transform_indices = @transform_0, window_bounds = array<i64: 1, 16, 64>}, {transform_indices = @transform_1, window_bounds = array<i64: 1, 8, 16>}, {transform_indices = @transform_2, window_bounds = array<i64: 1, 8, 1>}, {transform_indices = @transform_3, window_bounds = array<i64: 1, 8, 64>}]} {
    %c0 = arith.constant 0 : index
    %c0_0 = arith.constant 0 : index
    %c0_1 = arith.constant 0 : index
    %0 = vector.load %arg3[%c0, %c0_0, %c0_1] : memref<1x8x16xf32, #tpu.memory_space<vmem>>, vector<1x8x16xf32>
    %1 = vector.shape_cast %0 : vector<1x8x16xf32> to vector<8x16xf32>
    %c0_2 = arith.constant 0 : index
    %c0_3 = arith.constant 0 : index
    %c0_4 = arith.constant 0 : index
    %2 = vector.load %arg2[%c0_2, %c0_3, %c0_4] : memref<1x16x64xf32, #tpu.memory_space<vmem>>, vector<1x16x64xf32>
    %3 = vector.shape_cast %2 : vector<1x16x64xf32> to vector<16x64xf32>
    %cst = arith.constant dense<0.000000e+00> : vector<8x64xf32>
    %4 = tpu.matmul %1, %3, %cst {dimension_numbers = #tpu.dot_dimension_numbers<[1], [0], [0], [1], [0, 0, 1, 1], [], []>} : vector<8x16xf32>, vector<16x64xf32>, vector<8x64xf32> -> vector<8x64xf32>
    %c0_5 = arith.constant 0 : index
    %c0_6 = arith.constant 0 : index
    %c0_7 = arith.constant 0 : index
    %5 = vector.load %arg4[%c0_5, %c0_6, %c0_7] : memref<1x8x1xf32, #tpu.memory_space<vmem>>, vector<1x8x1xf32>
    %6 = vector.shape_cast %5 : vector<1x8x1xf32> to vector<8x1xf32>
    %7 = vector.broadcast %6 : vector<8x1xf32> to vector<8x64xf32>
    %8 = arith.addf %4, %7 : vector<8x64xf32>
    %c0_8 = arith.constant 0 : index
    %c0_9 = arith.constant 0 : index
    %c0_10 = arith.constant 0 : index
    %9 = vector.load %arg5[%c0_8, %c0_9, %c0_10] : memref<1x8x64xf32, #tpu.memory_space<vmem>>, vector<1x8x64xf32>
    %10 = vector.shape_cast %9 : vector<1x8x64xf32> to vector<8x64xf32>
    %11 = vector.shape_cast %8 : vector<8x64xf32> to vector<1x8x64xf32>
    tpu.vector_store %arg5[%c0_8, %c0_9, %c0_10], %11 {strides = array<i32>} : memref<1x8x64xf32, #tpu.memory_space<vmem>>, vector<1x8x64xf32>,
    return
  }
  func.func @transform_0(%arg0: i32, %arg1: i32) -> (i32, i32, i32) {
    %c0_i32 = arith.constant 0 : i32
    %c0_i32_0 = arith.constant 0 : i32
    return %arg0, %c0_i32, %arg1 : i32, i32, i32
  }
  func.func @transform_1(%arg0: i32, %arg1: i32) -> (i32, i32, i32) {
    %c0_i32 = arith.constant 0 : i32
    %c0_i32_0 = arith.constant 0 : i32
    %c0_i32_1 = arith.constant 0 : i32
    return %arg0, %c0_i32, %c0_i32_0 : i32, i32, i32
  }
  func.func @transform_2(%arg0: i32, %arg1: i32) -> (i32, i32, i32) {
    %c0_i32 = arith.constant 0 : i32
    %c0_i32_0 = arith.constant 0 : i32
    %c0_i32_1 = arith.constant 0 : i32
    return %arg0, %c0_i32, %c0_i32_0 : i32, i32, i32
  }
  func.func @transform_3(%arg0: i32, %arg1: i32) -> (i32, i32, i32) {
    %c0_i32 = arith.constant 0 : i32
    %c0_i32_0 = arith.constant 0 : i32
    return %arg0, %c0_i32, %arg1 : i32, i32, i32
  }
}

</mosaic_0001>

<bundles_post_ra>
// kernel: tile.18
= control target key start
LH: loop header
LB: loop body
LE: loop exit
PB: predicated region body
PF: predicated region fallthrough
CT: control target
= control target key end

     0   :  { %s52_s8 = smov 3  ;;  %s33_s9 = smov 3  ;;  %vm35_vm0 = vcmask 31744   ;;  %vm42_vm1 = vcmask 130144   ;;  %vm49_vm2 = vcmask 97344   ;;  %vm56_vm3 = vcmask 64544   ;;  %s91_s0 = inlined_call_operand.vmem [shape: bf16[2,4,4], index: 0, kind: input, shape index: {}]   ;;  %s92_s1 = inlined_call_operand.vmem [shape: bf16[2,16], index: 1, kind: output, shape index: {}]  }
   0x1   :  { %v66_v0 = vld [vmem:[%s91_s0] sm:$0xf]   ;;  %s38_s0 = smov 3  ;;  %s45_s10 = smov 3  ;;  %v74_v10 = vmov 0.0  }
   0x2   :  { %v16_v1 = vunpack.c.l.bf16 %v66_v0  ;;  %s71_s11 = smov 12   ;;  %s72_s12 = smov 4  }
   0x3   :  { %s73_s13 = smov 8  }
   0x4   :  { %19 = vst [vmem:[#allocation1] ss:$8 sps:$4 sm:$0xff] %v16_v1  }
   0xb   :  { %v39_v2 = vld [vmem:[#allocation1 + $0x3] ss:$8 sm:%s38_s0]   ;;  %v53_v3 = vld [vmem:[#allocation1 + $0x1] ss:$8 sm:%s52_s8]   ;;  %v34_v4 = vld [vmem:[#allocation1] ss:$8 sm:%s33_s9]  }
   0xc   :  { %40 = vrot.lane.b32.xlu0 %v39_v2, %s71_s11  ;;  %54 = vrot.lane.b32.xlu1 %v53_v3, %s72_s12  ;;  %v46_v5 = vld [vmem:[#allocation1 + $0x2] ss:$8 sm:%s45_s10]   ;;  %36 = vst.msk [vmem:[#allocation0] sm:$0x3] %vm35_vm0, %v34_v4  }
  0x10   :  { %47 = vrot.lane.b32.xlu0 %v46_v5, %s73_s13 }
  0x7e   :  { %v41_v6 = vpop.permute.xlu0 %40   ;;  %v55_v7 = vpop.permute.xlu1 %54  }
  0x7f   :  { %43 = vst.msk [vmem:[#allocation0] sm:$0x3] %vm42_vm1, %v41_v6  }
  0x82   :  { %v48_v8 = vpop.permute.xlu0 %47  }
  0x83   :  { %50 = vst.msk [vmem:[#allocation0] sm:$0x3] %vm49_vm2, %v48_v8  }
  0x84   :  { %57 = vst.msk [vmem:[#allocation0] sm:$0x3] %vm56_vm3, %v55_v7  }
  0x8b   :  { %v62_v9 = vld [vmem:[#allocation0] sm:$0x3] }
  0x8c   :  { %v63_v11 = vpack.c.bf16 %v74_v10, %v62_v9 }
  0x8e   :  { %65 = vst [vmem:[%s92_s1] sm:$0x1] %v63_v11 }

// kernel: downscale.1
= control target key start
LH: loop header
LB: loop body
LE: loop exit
PB: predicated region body
PF: predicated region fallthrough
CT: control target
= control target key end

     0   :  { %s524_s12 = smov 0   ;;  %s526_s13 = smov 0   ;;  %s563_s0 = inlined_call_operand.vmem [shape: f32[2,16,64], index: 0, kind: input, shape index: {}]   ;;  %s564_s1 = inlined_call_operand.vmem [shape: f32[2,8,16], index: 1, kind: input, shape index: {}]   ;;  %s565_s2 = inlined_call_operand.vmem [shape: f32[2,8,1], index: 2, kind: input, shape index: {}]   ;;  %s566_s3 = inlined_call_operand.vmem [shape: f32[2,8,64], index: 3, kind: output, shape index: {}]  }
   0x1   :  { %s528_s14 = smov 0  }
   0x2 LB: > { %s25_s15 = sadd.s32 1, %s494_s13  ;;  %p424_p0 = scmp.ge.s32.totalorder %s498_s14, 1  ;;  %s498_s14 = sphi %s528_s14, %s13_s14   ;;  %s494_s13 = sphi %s526_s13, %s568_s13   ;;  %s490_s12 = sphi %s524_s12, %s567_s12  }
   0x3   : > { %p27_p1 = scmp.ge.s32.totalorder %s25_s15, 2  ;;  %p174_p2 = scmp.lt.s32.totalorder %s498_s14, 3 }
   0x5   : > { %s570_s15 = smov (%p27_p1, %s25_s15), 0  ;;  %p175_p3 = pnand %p424_p0, %p174_p2 }
   0x6   : > { %p211_p4 = scmp.lt.s32.totalorder (!%p175_p3), %s490_s12, 1  ;;  %v500_v0 = vmov (!%p175_p3), 0.0|0.0   ;;  %vm501_vm0 = vmmov (!%p175_p3), 0   ;;  %v502_v1 = vmov (!%p175_p3), 0.0   ;;  %v503_v2 = vmov (!%p175_p3), 0  }
   0x7   : > { %178 = sbr.rel (%p175_p3) target bundleno = 238 (0xee), region = 32  ;;  %444 = vmatprep.subr.bf16.mxu0 (!%p175_p3), %v500_v0  ;;  %441 = vmatprep.mubr.msk.f32.mxu0 (!%p175_p3), %vm501_vm0, %v502_v1  ;;  %vm243_vm1 = vcmask (!%p175_p3), 130048   ;;  %vm317_vm2 = vcmask (!%p175_p3), 523264  }
   0x8   : > { %475 = vset.pattern.permute.xlu0 (!%p175_p3), %v503_v2 }
   0xe   : > { %s572_s12 = smov (!%p211_p4, %s490_s12), 1 }
   0xf   : > { %s433_s16 = sshll.u32 %s572_s12, 4  ;;  %s427_s17 = sshll.u32 %s572_s12, 3 }
  0x10   : > { %s218_s20 = scalar_lea.vmem %s563_s0, %s433_s16  ;;  %s222_s23 = scalar_lea.vmem %s564_s1, %s427_s17 }
  0x11   : > { %v235_v3 = vld [vmem:[%s218_s20] sm:$0xff]  ;;  %v236_v4 = vld [vmem:[%s218_s20 + $0x8] sm:$0xff]  ;;  %s226_s26 = scalar_lea.vmem %s565_s2, %s427_s17  ;;  %s233_s29 = scalar_lea.vmem %s566_s3, %s427_s17 }
  0x12   : > { %v445_v5 = vpack.c.bf16 %v236_v4, %v235_v3  ;;  %v237_v6 = vld [vmem:[%s226_s26] sm:$0xff] }
  0x13   : > { %240 = vperm.xlu0 %475, %v237_v6   ;;  %v234_v7 = vld [vmem:[%s222_s23] sm:$0xff] }
  0x14   : > { %446 = vmatpush3.bf16.msra.mxu0 %v445_v5 }
  0x17   : > { %442 = vmatmul.mubr.msk.f32.vlgmr.msra.gmra.mrb[0].mxu0 %vm243_vm1, %v234_v7 }
  0x92   : > { %v241_v8 = vpop.permute.xlu0 %240 }
  0xea   : > { %v313_v9 = vpop.f32.mrb[0].mxu0 }
  0xeb   : > { %v314_v10 = vadd.f32 %v313_v9, %v241_v8  ;;  %v443_v11 = vpop.f32.mrb[1].mxu0 }
  0xed   : > { %318 = vst.msk [vmem:[%s233_s29] sm:$0xff] %vm317_vm2, %v314_v10 }
  0xee PF: > { %s13_s14 = sadd.s32 1, %s498_s14   ;;  %s567_s12 = smov %s494_s13 }
  0xef   : > { %p10_p5 = scmp.ge.s32.totalorder %s13_s14, 4   ;;  %s568_s13 = smov %s570_s15 }
  0xf1   :  { %12 = sbr.rel (!%p10_p5) target bundleno = 2 (0x2), region = 68 }

</bundles_post_ra>
